<compile_context>
chip_gen: v7x
topology: tpu7x:2x2x1
jax: 0.10.0
libtpu: 0.0.40
codegen_flags: <defaults>
</compile_context>

<pallas_src>
import functools

import jax
import jax.numpy as jnp
from jax.experimental import pallas as pl
from jax.experimental.pallas import tpu as pltpu


# --------------------------------------------------------------------------- #
# Kernel
# --------------------------------------------------------------------------- #
def _res_block_kernel(x_ref, w1_ref, s1_ref, b1_ref,
                      w2_ref, s2_ref, b2_ref,
                      w3_ref, s3_ref, b3_ref,
                      o_ref, *, add):
    # x_ref: (1, H, W*Cin) -- lane-dense (W*Cin maps to the 128-lane axis).
    _, H, _ = x_ref.shape
    WCm = w1_ref.shape[1]                        # W * Cmid

    x = x_ref[0]                                 # (H, W*Cin) full-lane f32 load

    # ---- CNS 1: 1x1 conv (block-diagonal packed weight) + BN + swish --------
    h1 = jnp.dot(x.astype(jnp.bfloat16), w1_ref[...],
                 preferred_element_type=jnp.float32)          # (H, W*Cmid)
    h1 = h1 * s1_ref[...] + b1_ref[...]
    h1 = h1 * jax.nn.sigmoid(h1)

    # ---- CNS 2: 3x3 conv (padding=1) + BN + swish as ONE matmul -------------
    # dy (row) taps: register-resident shifted copies of h1 with a zero halo
    # row; dx (column) taps are folded into the banded weight w2_ref.
    zrow = jnp.zeros((1, WCm), jnp.float32)
    up = jnp.concatenate([zrow, h1[:H - 1, :]], axis=0)       # up[h] = h1[h-1]
    dn = jnp.concatenate([h1[1:, :], zrow], axis=0)           # dn[h] = h1[h+1]
    taps = jnp.concatenate([up, h1, dn], axis=1)              # (H, 3*W*Cmid)
    h2 = jnp.dot(taps.astype(jnp.bfloat16), w2_ref[...],
                 preferred_element_type=jnp.float32)          # (H, W*Cmid)
    h2 = h2 * s2_ref[...] + b2_ref[...]
    h2 = h2 * jax.nn.sigmoid(h2)

    # ---- CNS 3: 1x1 conv + BN (no activation) -------------------------------
    h3 = jnp.dot(h2.astype(jnp.bfloat16), w3_ref[...],
                 preferred_element_type=jnp.float32)          # (H, W*Cout)
    h3 = h3 * s3_ref[...] + b3_ref[...]

    if add:
        # Re-read x from VMEM right before the store (keeps live ranges short).
        h3 = h3 + x_ref[0]

    o_ref[...] = h3.reshape(o_ref.shape).astype(o_ref.dtype)  # full-lane store


# --------------------------------------------------------------------------- #
# Host-side weight packing for the lane-dense (H, W*C) layout
# --------------------------------------------------------------------------- #
def _fold_bn(gamma, beta, mean, var, eps=1e-5):
    scale = gamma / jnp.sqrt(var + eps)
    bias = beta - mean * scale
    return scale.reshape(1, -1), bias.reshape(1, -1)


def _pack_pointwise(w, W):
    """(Cin, Cout) -> block-diagonal (W*Cin, W*Cout): 1x1 conv as one matmul."""
    return jnp.kron(jnp.eye(W, dtype=w.dtype), w)


def _pack_conv3x3(w2, W):
    """w2: (9, Cmid, Cmid) with t = dy*3+dx, [ci, co] -> banded (3*W*Cmid, W*Cmid).

    Row-block dy multiplies the dy-shifted copy of h1; within a block the dx
    shift is the W x W off-diagonal  S_dx[u, w] = 1  iff  u == w + dx - 1,
    which also realizes the SAME zero padding at the left/right edges.
    """
    cm_i, cm_o = w2.shape[1], w2.shape[2]
    shift = {0: jnp.eye(W, k=1, dtype=w2.dtype),
             1: jnp.eye(W, k=0, dtype=w2.dtype),
             2: jnp.eye(W, k=-1, dtype=w2.dtype)}
    blocks = []
    for dy in range(3):
        m = jnp.zeros((W * cm_i, W * cm_o), w2.dtype)
        for dx in range(3):
            m = m + jnp.kron(shift[dx], w2[dy * 3 + dx])
        blocks.append(m)
    return jnp.concatenate(blocks, axis=0)


def _pack_params(params, W, mxu_dtype=jnp.bfloat16):
    w1, s1, b1, w2, s2, b2, w3, s3, b3 = params
    tile = lambda v: jnp.tile(v.reshape(1, -1), (1, W)).astype(jnp.float32)
    return (_pack_pointwise(w1, W).astype(mxu_dtype), tile(s1), tile(b1),
            _pack_conv3x3(w2, W).astype(mxu_dtype), tile(s2), tile(b2),
            _pack_pointwise(w3, W).astype(mxu_dtype), tile(s3), tile(b3))


# --------------------------------------------------------------------------- #
# pallas_call wrapper
# --------------------------------------------------------------------------- #
def _res_block_pallas(x_pack, packed, *, Cin, Cmid, Cout, add):
    N, H, WCin = x_pack.shape
    W = WCin // Cin

    def full_spec(a):
        return pl.BlockSpec(a.shape, lambda n, nd=a.ndim: (0,) * nd)

    flops = 2 * N * H * W * (Cin * Cmid + 9 * Cmid * Cmid + Cmid * Cout)
    transcendentals = 2 * N * H * W * Cmid          # two swish (sigmoid) layers
    bytes_accessed = (int(x_pack.size) * x_pack.dtype.itemsize
                      + N * H * W * Cout * 4
                      + sum(int(a.size) * a.dtype.itemsize for a in packed))

    kernel = functools.partial(_res_block_kernel, add=add)
    return pl.pallas_call(
        kernel,
        out_shape=jax.ShapeDtypeStruct((N, H, W * Cout), x_pack.dtype),
        grid_spec=pltpu.PrefetchScalarGridSpec(
            num_scalar_prefetch=0,
            grid=(N,),
            in_specs=[pl.BlockSpec((1, H, W * Cin), lambda n: (n, 0, 0))]
                     + [full_spec(a) for a in packed],
            out_specs=pl.BlockSpec((1, H, W * Cout), lambda n: (n, 0, 0)),
        ),
        compiler_params=pltpu.CompilerParams(
            dimension_semantics=("parallel",),
            vmem_limit_bytes=32 * 1024 * 1024),
        cost_estimate=pl.CostEstimate(flops=flops,
                                      transcendentals=transcendentals,
                                      bytes_accessed=bytes_accessed),
    )(x_pack, *packed)


def res_block_forward_nchw(x_nchw, params, *, stride=1, dilation=1):
    N, Cin, H, W = x_nchw.shape
    w1, w3 = params[0], params[6]
    Cmid, Cout = w1.shape[1], w3.shape[1]

    # Guard configurations this kernel does not implement.
    assert stride == 1 and dilation == 1, \
        "TODO(synk): stride/dilation != 1 not implemented in the Pallas kernel"
    assert Cout % 64 != 0, \
        "TODO(synk): grouped 3x3 conv (groups=32) not implemented"

    add = (stride == 1 and Cin == Cout)

    # NCHW -> NHWC -> lane-dense (N, H, W*C); W*C is a multiple of 128 here.
    x_pack = jnp.transpose(x_nchw, (0, 2, 3, 1)).reshape(N, H, W * Cin)
    packed = _pack_params(params, W)
    y_pack = _res_block_pallas(x_pack, packed, Cin=Cin, Cmid=Cmid, Cout=Cout,
                               add=add)
    return jnp.transpose(y_pack.reshape(N, H, W, Cout), (0, 3, 1, 2))


# --------------------------------------------------------------------------- #
# Pure-JAX f32 reference (for checking) and test params
# --------------------------------------------------------------------------- #
def res_block_reference_nchw(x_nchw, params, add):
    w1, s1, b1, w2, s2, b2, w3, s3, b3 = params
    Cmid = w1.shape[1]
    x = jnp.transpose(x_nchw, (0, 2, 3, 1))
    h = jnp.einsum('nhwc,cd->nhwd', x, w1) * s1 + b1
    h = h * jax.nn.sigmoid(h)
    h = jax.lax.conv_general_dilated(
        h, w2.reshape(3, 3, Cmid, Cmid), window_strides=(1, 1), padding='SAME',
        dimension_numbers=('NHWC', 'HWIO', 'NHWC'))
    h = h * s2 + b2
    h = h * jax.nn.sigmoid(h)
    h = jnp.einsum('nhwc,cd->nhwd', h, w3) * s3 + b3
    if add:
        h = h + x
    return jnp.transpose(h, (0, 3, 1, 2))


def make_params(key, cin, cout):
    cmid = cout // 2
    ks = jax.random.split(key, 6)
    w1 = 0.2 * jax.random.normal(ks[0], (cin, cmid), jnp.float32)
    w2 = 0.2 * jax.random.normal(ks[1], (9, cmid, cmid), jnp.float32)
    w3 = 0.2 * jax.random.normal(ks[2], (cmid, cout), jnp.float32)

    def bn(k4, c):
        kg, kb, km, kv = jax.random.split(k4, 4)
        gamma = 1.0 + 0.1 * jax.random.normal(kg, (c,), jnp.float32)
        beta = 0.1 * jax.random.normal(kb, (c,), jnp.float32)
        mean = 0.1 * jax.random.normal(km, (c,), jnp.float32)
        var = jax.random.uniform(kv, (c,), jnp.float32, minval=0.5, maxval=1.5)
        return _fold_bn(gamma, beta, mean, var)

    s1, b1 = bn(ks[3], cmid)
    s2, b2 = bn(ks[4], cmid)
    s3, b3 = bn(ks[5], cout)
    return (w1, s1, b1, w2, s2, b2, w3, s3, b3)


if __name__ == "__main__":
    N, C, H, W = 2, 8, 16, 16          # stride=1, Cin == Cout -> residual path
    in_channels = out_channels = C

    key = jax.random.PRNGKey(0)
    kx, kp = jax.random.split(key)
    x_nchw = jax.random.normal(kx, (N, C, H, W), jnp.float32)
    params = make_params(kp, in_channels, out_channels)

    y = res_block_forward_nchw(x_nchw, params)
    y = jax.block_until_ready(y)

    # Correctness vs. pure-f32 reference.  MXU operands are bf16 (f32
    # accumulation), so allow bf16-level tolerance.
    y_ref = res_block_reference_nchw(x_nchw, params, add=True)
    assert y.shape == (N, out_channels, H, W)
    assert jnp.allclose(y, y_ref, rtol=5e-2, atol=5e-2), (
        "mismatch vs reference: max abs err "
        f"{float(jnp.max(jnp.abs(y - y_ref)))}")
    print("KERNEL_OK")
</pallas_src>

<mosaic_0001>
module attributes {stable_mosaic.version = 11 : i64} {
  func.func @_res_block_kernel(%arg0: i32, %arg1: memref<1x16x128xf32, #tpu.memory_space<vmem>>, %arg2: memref<128x64xbf16, #tpu.memory_space<vmem>>, %arg3: memref<1x64xf32, #tpu.memory_space<vmem>>, %arg4: memref<1x64xf32, #tpu.memory_space<vmem>>, %arg5: memref<192x64xbf16, #tpu.memory_space<vmem>>, %arg6: memref<1x64xf32, #tpu.memory_space<vmem>>, %arg7: memref<1x64xf32, #tpu.memory_space<vmem>>, %arg8: memref<64x128xbf16, #tpu.memory_space<vmem>>, %arg9: memref<1x128xf32, #tpu.memory_space<vmem>>, %arg10: memref<1x128xf32, #tpu.memory_space<vmem>>, %arg11: memref<1x16x128xf32, #tpu.memory_space<vmem>>) attributes {dimension_semantics = [#tpu.dimension_semantics<parallel>], iteration_bounds = array<i64: 2>, scalar_prefetch = 0 : i64, scratch_operands = 0 : i64, tpu.core_type = #tpu.core_type<tc>, window_params = [{transform_indices = @transform_0, window_bounds = array<i64: 1, 16, 128>}, {pipeline_mode = #tpu.pipeline_mode<synchronous>, transform_indices = @transform_1, window_bounds = array<i64: 128, 64>}, {pipeline_mode = #tpu.pipeline_mode<synchronous>, transform_indices = @transform_2, window_bounds = array<i64: 1, 64>}, {pipeline_mode = #tpu.pipeline_mode<synchronous>, transform_indices = @transform_3, window_bounds = array<i64: 1, 64>}, {pipeline_mode = #tpu.pipeline_mode<synchronous>, transform_indices = @transform_4, window_bounds = array<i64: 192, 64>}, {pipeline_mode = #tpu.pipeline_mode<synchronous>, transform_indices = @transform_5, window_bounds = array<i64: 1, 64>}, {pipeline_mode = #tpu.pipeline_mode<synchronous>, transform_indices = @transform_6, window_bounds = array<i64: 1, 64>}, {pipeline_mode = #tpu.pipeline_mode<synchronous>, transform_indices = @transform_7, window_bounds = array<i64: 64, 128>}, {pipeline_mode = #tpu.pipeline_mode<synchronous>, transform_indices = @transform_8, window_bounds = array<i64: 1, 128>}, {pipeline_mode = #tpu.pipeline_mode<synchronous>, transform_indices = @transform_9, window_bounds = array<i64: 1, 128>}, {transform_indices = @transform_10, window_bounds = array<i64: 1, 16, 128>}]} {
    %c0 = arith.constant 0 : index
    %c0_0 = arith.constant 0 : index
    %c0_1 = arith.constant 0 : index
    %0 = vector.load %arg1[%c0, %c0_0, %c0_1] : memref<1x16x128xf32, #tpu.memory_space<vmem>>, vector<1x16x128xf32>
    %1 = vector.shape_cast %0 : vector<1x16x128xf32> to vector<16x128xf32>
    %2 = arith.truncf %1 : vector<16x128xf32> to vector<16x128xbf16>
    %c0_2 = arith.constant 0 : index
    %c0_3 = arith.constant 0 : index
    %3 = vector.load %arg2[%c0_2, %c0_3] : memref<128x64xbf16, #tpu.memory_space<vmem>>, vector<128x64xbf16>
    %cst = arith.constant dense<0.000000e+00> : vector<16x64xf32>
    %4 = tpu.matmul %2, %3, %cst {dimension_numbers = #tpu.dot_dimension_numbers<[1], [0], [0], [1], [0, 0, 1, 1], [], []>} : vector<16x128xbf16>, vector<128x64xbf16>, vector<16x64xf32> -> vector<16x64xf32>
    %c0_4 = arith.constant 0 : index
    %c0_5 = arith.constant 0 : index
    %5 = vector.load %arg3[%c0_4, %c0_5] : memref<1x64xf32, #tpu.memory_space<vmem>>, vector<1x64xf32>
    %6 = vector.broadcast %5 : vector<1x64xf32> to vector<16x64xf32>
    %7 = arith.mulf %4, %6 : vector<16x64xf32>
    %c0_6 = arith.constant 0 : index
    %c0_7 = arith.constant 0 : index
    %8 = vector.load %arg4[%c0_6, %c0_7] : memref<1x64xf32, #tpu.memory_space<vmem>>, vector<1x64xf32>
    %9 = vector.broadcast %8 : vector<1x64xf32> to vector<16x64xf32>
    %10 = arith.addf %7, %9 : vector<16x64xf32>
    %11 = arith.negf %10 : vector<16x64xf32>
    %12 = math.exp %11 : vector<16x64xf32>
    %cst_8 = arith.constant 1.000000e+00 : f32
    %13 = vector.broadcast %cst_8 : f32 to vector<16x64xf32>
    %14 = arith.addf %13, %12 : vector<16x64xf32>
    %15 = arith.divf %13, %14 : vector<16x64xf32>
    %16 = arith.mulf %10, %15 : vector<16x64xf32>
    %cst_9 = arith.constant 0.000000e+00 : f32
    %17 = vector.broadcast %cst_9 : f32 to vector<1x64xf32>
    %18 = vector.extract_strided_slice %16 {offsets = [0, 0], sizes = [15, 64], strides = [1, 1]} : vector<16x64xf32> to vector<15x64xf32>
    %19 = tpu.concatenate %17, %18 in 0 : vector<1x64xf32>, vector<15x64xf32> -> vector<16x64xf32>
    %20 = vector.extract_strided_slice %16 {offsets = [1, 0], sizes = [15, 64], strides = [1, 1]} : vector<16x64xf32> to vector<15x64xf32>
    %21 = tpu.concatenate %20, %17 in 0 : vector<15x64xf32>, vector<1x64xf32> -> vector<16x64xf32>
    %22 = tpu.concatenate %19, %16, %21 in 1 : vector<16x64xf32>, vector<16x64xf32>, vector<16x64xf32> -> vector<16x192xf32>
    %23 = arith.truncf %22 : vector<16x192xf32> to vector<16x192xbf16>
    %c0_10 = arith.constant 0 : index
    %c0_11 = arith.constant 0 : index
    %24 = vector.load %arg5[%c0_10, %c0_11] : memref<192x64xbf16, #tpu.memory_space<vmem>>, vector<192x64xbf16>
    %cst_12 = arith.constant dense<0.000000e+00> : vector<16x64xf32>
    %25 = tpu.matmul %23, %24, %cst_12 {dimension_numbers = #tpu.dot_dimension_numbers<[1], [0], [0], [1], [0, 0, 1, 1], [], []>} : vector<16x192xbf16>, vector<192x64xbf16>, vector<16x64xf32> -> vector<16x64xf32>
    %c0_13 = arith.constant 0 : index
    %c0_14 = arith.constant 0 : index
    %26 = vector.load %arg6[%c0_13, %c0_14] : memref<1x64xf32, #tpu.memory_space<vmem>>, vector<1x64xf32>
    %27 = vector.broadcast %26 : vector<1x64xf32> to vector<16x64xf32>
    %28 = arith.mulf %25, %27 : vector<16x64xf32>
    %c0_15 = arith.constant 0 : index
    %c0_16 = arith.constant 0 : index
    %29 = vector.load %arg7[%c0_15, %c0_16] : memref<1x64xf32, #tpu.memory_space<vmem>>, vector<1x64xf32>
    %30 = vector.broadcast %29 : vector<1x64xf32> to vector<16x64xf32>
    %31 = arith.addf %28, %30 : vector<16x64xf32>
    %32 = arith.negf %31 : vector<16x64xf32>
    %33 = math.exp %32 : vector<16x64xf32>
    %cst_17 = arith.constant 1.000000e+00 : f32
    %34 = vector.broadcast %cst_17 : f32 to vector<16x64xf32>
    %35 = arith.addf %34, %33 : vector<16x64xf32>
    %36 = arith.divf %34, %35 : vector<16x64xf32>
    %37 = arith.mulf %31, %36 : vector<16x64xf32>
    %38 = arith.truncf %37 : vector<16x64xf32> to vector<16x64xbf16>
    %c0_18 = arith.constant 0 : index
    %c0_19 = arith.constant 0 : index
    %39 = vector.load %arg8[%c0_18, %c0_19] : memref<64x128xbf16, #tpu.memory_space<vmem>>, vector<64x128xbf16>
    %cst_20 = arith.constant dense<0.000000e+00> : vector<16x128xf32>
    %40 = tpu.matmul %38, %39, %cst_20 {dimension_numbers = #tpu.dot_dimension_numbers<[1], [0], [0], [1], [0, 0, 1, 1], [], []>} : vector<16x64xbf16>, vector<64x128xbf16>, vector<16x128xf32> -> vector<16x128xf32>
    %c0_21 = arith.constant 0 : index
    %c0_22 = arith.constant 0 : index
    %41 = vector.load %arg9[%c0_21, %c0_22] : memref<1x128xf32, #tpu.memory_space<vmem>>, vector<1x128xf32>
    %42 = vector.broadcast %41 : vector<1x128xf32> to vector<16x128xf32>
    %43 = arith.mulf %40, %42 : vector<16x128xf32>
    %c0_23 = arith.constant 0 : index
    %c0_24 = arith.constant 0 : index
    %44 = vector.load %arg10[%c0_23, %c0_24] : memref<1x128xf32, #tpu.memory_space<vmem>>, vector<1x128xf32>
    %45 = vector.broadcast %44 : vector<1x128xf32> to vector<16x128xf32>
    %46 = arith.addf %43, %45 : vector<16x128xf32>
    %c0_25 = arith.constant 0 : index
    %c0_26 = arith.constant 0 : index
    %c0_27 = arith.constant 0 : index
    %47 = vector.load %arg1[%c0_25, %c0_26, %c0_27] : memref<1x16x128xf32, #tpu.memory_space<vmem>>, vector<1x16x128xf32>
    %48 = vector.shape_cast %47 : vector<1x16x128xf32> to vector<16x128xf32>
    %49 = arith.addf %46, %48 : vector<16x128xf32>
    %50 = vector.shape_cast %49 : vector<16x128xf32> to vector<1x16x128xf32>
    %c0_28 = arith.constant 0 : index
    %c0_29 = arith.constant 0 : index
    %c0_30 = arith.constant 0 : index
    %51 = vector.load %arg11[%c0_28, %c0_29, %c0_30] : memref<1x16x128xf32, #tpu.memory_space<vmem>>, vector<1x16x128xf32>
    tpu.vector_store %arg11[%c0_28, %c0_29, %c0_30], %50 {strides = array<i32>} : memref<1x16x128xf32, #tpu.memory_space<vmem>>, vector<1x16x128xf32>,
    return
  }
  func.func @transform_0(%arg0: i32) -> (i32, i32, i32) {
    %c0_i32 = arith.constant 0 : i32
    %c0_i32_0 = arith.constant 0 : i32
    %c0_i32_1 = arith.constant 0 : i32
    return %arg0, %c0_i32, %c0_i32_0 : i32, i32, i32
  }
  func.func @transform_1(%arg0: i32) -> (i32, i32) {
    %c0_i32 = arith.constant 0 : i32
    %c0_i32_0 = arith.constant 0 : i32
    %c0_i32_1 = arith.constant 0 : i32
    return %c0_i32, %c0_i32_0 : i32, i32
  }
  func.func @transform_2(%arg0: i32) -> (i32, i32) {
    %c0_i32 = arith.constant 0 : i32
    %c0_i32_0 = arith.constant 0 : i32
    %c0_i32_1 = arith.constant 0 : i32
    return %c0_i32, %c0_i32_0 : i32, i32
  }
  func.func @transform_3(%arg0: i32) -> (i32, i32) {
    %c0_i32 = arith.constant 0 : i32
    %c0_i32_0 = arith.constant 0 : i32
    %c0_i32_1 = arith.constant 0 : i32
    return %c0_i32, %c0_i32_0 : i32, i32
  }
  func.func @transform_4(%arg0: i32) -> (i32, i32) {
    %c0_i32 = arith.constant 0 : i32
    %c0_i32_0 = arith.constant 0 : i32
    %c0_i32_1 = arith.constant 0 : i32
    return %c0_i32, %c0_i32_0 : i32, i32
  }
  func.func @transform_5(%arg0: i32) -> (i32, i32) {
    %c0_i32 = arith.constant 0 : i32
    %c0_i32_0 = arith.constant 0 : i32
    %c0_i32_1 = arith.constant 0 : i32
    return %c0_i32, %c0_i32_0 : i32, i32
  }
  func.func @transform_6(%arg0: i32) -> (i32, i32) {
    %c0_i32 = arith.constant 0 : i32
    %c0_i32_0 = arith.constant 0 : i32
    %c0_i32_1 = arith.constant 0 : i32
    return %c0_i32, %c0_i32_0 : i32, i32
  }
  func.func @transform_7(%arg0: i32) -> (i32, i32) {
    %c0_i32 = arith.constant 0 : i32
    %c0_i32_0 = arith.constant 0 : i32
    %c0_i32_1 = arith.constant 0 : i32
    return %c0_i32, %c0_i32_0 : i32, i32
  }
  func.func @transform_8(%arg0: i32) -> (i32, i32) {
    %c0_i32 = arith.constant 0 : i32
    %c0_i32_0 = arith.constant 0 : i32
    %c0_i32_1 = arith.constant 0 : i32
    return %c0_i32, %c0_i32_0 : i32, i32
  }
  func.func @transform_9(%arg0: i32) -> (i32, i32) {
    %c0_i32 = arith.constant 0 : i32
    %c0_i32_0 = arith.constant 0 : i32
    %c0_i32_1 = arith.constant 0 : i32
    return %c0_i32, %c0_i32_0 : i32, i32
  }
  func.func @transform_10(%arg0: i32) -> (i32, i32, i32) {
    %c0_i32 = arith.constant 0 : i32
    %c0_i32_0 = arith.constant 0 : i32
    %c0_i32_1 = arith.constant 0 : i32
    return %arg0, %c0_i32, %c0_i32_0 : i32, i32, i32
  }
}

</mosaic_0001>

<bundles_post_ra>
// kernel: tpu_custom_call.1
= control target key start
LH: loop header
LB: loop body
LE: loop exit
PB: predicated region body
PF: predicated region fallthrough
CT: control target
= control target key end

     0   :  { %15 = vsyncpa [#allocation3], 0  ;;  %s1406_s0 = inlined_call_operand.vmem [shape: f32[2,16,128], index: 0, kind: input, shape index: {}]   ;;  %s1407_s1 = inlined_call_operand.vmem [shape: bf16[128,64], index: 1, kind: input, shape index: {}]   ;;  %s1408_s2 = inlined_call_operand.vmem [shape: f32[1,64], index: 2, kind: input, shape index: {}]   ;;  %s1409_s3 = inlined_call_operand.vmem [shape: f32[1,64], index: 3, kind: input, shape index: {}]   ;;  %s1410_s4 = inlined_call_operand.vmem [shape: bf16[192,64], index: 4, kind: input, shape index: {}]   ;;  %s1411_s5 = inlined_call_operand.vmem [shape: f32[1,64], index: 5, kind: input, shape index: {}]   ;;  %s1412_s6 = inlined_call_operand.vmem [shape: f32[1,64], index: 6, kind: input, shape index: {}]   ;;  %s1413_s7 = inlined_call_operand.vmem [shape: bf16[64,128], index: 7, kind: input, shape index: {}]   ;;  %s1414_s8 = inlined_call_operand.vmem [shape: f32[1,128], index: 8, kind: input, shape index: {}]   ;;  %s1415_s9 = inlined_call_operand.vmem [shape: f32[1,128], index: 9, kind: input, shape index: {}]   ;;  %s1416_s10 = inlined_call_operand.hbm [shape: f32[2,16,128], index: 10, kind: output, shape index: {}]  }
   0x1   :  { %17 = vsyncpa [#allocation3 + $0x1], 0  ;;  %s1185_s13 = smov 0   ;;  %s1187_s14 = smov 0  }
   0x2   :  { %s1189_s15 = smov 0   ;;  %s1191_s16 = smov 0  }
   0x3 LB: > { %s1206_s17 = sadd.s32 4294967295, %s1121_s16   ;;  %s873_s18 = sadd.s32 4294967294, %s1121_s16   ;;  %s1121_s16 = sphi %s1191_s16, %s1422_s16   ;;  %s1117_s15 = sphi %s1189_s15, %s1421_s15   ;;  %s1113_s14 = sphi %s1187_s14, %s1420_s14   ;;  %s1109_s13 = sphi %s1185_s13, %s1419_s13  }
   0x4   : > { %s1210_s19 = sadd.s32 1, %s1121_s16   ;;  %s245_s20 = sadd.s32 1, %s1117_s15 }
   0x5   : > { %s242_s21 = ssub.s32 %s1121_s16, %s1210_s19  ;;  %p255_p0 = scmp.ne.s32.totalorder %s1117_s15, %s1113_s14 }
   0x6   : > { %p243_p1 = scmp.eq.s32.totalorder %s242_s21, 0  ;;  %p256_p2 = scmp.eq.s32.totalorder %s1206_s17, 1 }
   0x7   : > { %p261_p3 = scmp.ne.s32.totalorder %s1113_s14, %s1109_s13  ;;  %p262_p4 = scmp.eq.s32.totalorder %s873_s18, 1 }
   0x8   : > { %s1221_s22 = scalar_select %p243_p1, %s1117_s15, %s245_s20  }
   0x9   : > { %p1223_p5 = por %p256_p2, %p255_p0  ;;  %p1227_p6 = por %p262_p4, %p261_p3 }
   0xa   : > { %p876_p7 = scmp.ge.s32.totalorder %s1121_s16, 1  ;;  %p315_p8 = scmp.lt.s32.totalorder %s1121_s16, 3 }
   0xc   : > { %p316_p9 = pnand %p876_p7, %p315_p8 }
   0xd   : > { %v1019_v0 = vld [vmem:[%s1407_s1] sm:$0xff] (!%p316_p9)   ;;  %v1123_v1 = vmov (!%p316_p9), 0.0   ;;  %v1020_v2 = vld [vmem:[%s1407_s1 + $0x8] sm:$0xff] (!%p316_p9)   ;;  %vm1124_vm0 = vmmov (!%p316_p9), 0   ;;  %p353_p10 = scmp.lt.s32.totalorder (!%p316_p9), %s1206_s17, 1  ;;  %v1021_v3 = vld [vmem:[%s1407_s1 + $0x10] sm:$0xff] (!%p316_p9)  }
   0xe   : > { %319 = sbr.rel (%p316_p9) target bundleno = 897 (0x381), region = 60  ;;  %937 = vmatprep.subr.bf16.mxu0 (!%p316_p9), %v1123_v1  ;;  %953 = vmatprep.mubr.msk.bf16.mxu0 (!%p316_p9), %vm1124_vm0, %v1123_v1  ;;  %v1022_v4 = vld [vmem:[%s1407_s1 + $0x18] sm:$0xff] (!%p316_p9)   ;;  %v1023_v5 = vld [vmem:[%s1407_s1 + $0x20] sm:$0xff] (!%p316_p9)   ;;  %v1024_v6 = vld [vmem:[%s1407_s1 + $0x28] sm:$0xff] (!%p316_p9)   ;;  %v1125_v13 = vmov (!%p316_p9), 0   ;;  %vm508_vm1 = vcmask (!%p316_p9), 1046528  }
   0xf   : > { %938 = vmatpush3.bf16.msra.mxu0 (!%p316_p9), %v1019_v0  ;;  %v1025_v7 = vld [vmem:[%s1407_s1 + $0x30] sm:$0xff] (!%p316_p9)   ;;  %v1026_v8 = vld [vmem:[%s1407_s1 + $0x38] sm:$0xff] (!%p316_p9)   ;;  %v1027_v12 = vld [vmem:[%s1410_s4] sm:$0xff] (!%p316_p9)   ;;  %625 = vmatprep.subr.bf16.mxu1 (!%p316_p9), %v1125_v13  ;;  %vm501_vm2 = vcmask (!%p316_p9), 1040384   ;;  %s1126_s30 = smov (!%p316_p9), 64   ;;  %vm521_vm3 = vcmask (!%p316_p9), 523264  }
  0x10   : > { %939 = vmatprep.subr.bf16.mxu0 (!%p316_p9), %v1123_v1  ;;  %626 = vmatpush1.bf16.msra.mxu1 (!%p316_p9), %v1027_v12  ;;  %v1028_v14 = vld [vmem:[%s1410_s4 + $0x8] sm:$0xff] (!%p316_p9)   ;;  %v1029_v15 = vld [vmem:[%s1410_s4 + $0x10] sm:$0xff] (!%p316_p9)   ;;  %v1030_v16 = vld [vmem:[%s1410_s4 + $0x18] sm:$0xff] (!%p316_p9)   ;;  %s922_s29 = sshll.u32 (!%p316_p9), %s1206_s17, 8 }
  0x11   : > { %627 = vmatprep.subr.bf16.mxu1 (!%p316_p9), %v1125_v13  ;;  %v1031_v17 = vld [vmem:[%s1410_s4 + $0x20] sm:$0xff] (!%p316_p9)   ;;  %v1032_v18 = vld [vmem:[%s1410_s4 + $0x28] sm:$0xff] (!%p316_p9)   ;;  %v1033_v19 = vld [vmem:[%s1410_s4 + $0x30] sm:$0xff] (!%p316_p9)   ;;  %s1362_s21 = scalar_lea.hbm (!%p316_p9), %s1416_s10, %s922_s29 }
  0x12   : > { %v1034_v20 = vld [vmem:[%s1410_s4 + $0x38] sm:$0xff] (!%p316_p9)   ;;  %v1035_v21 = vld [vmem:[%s1410_s4 + $0x40] sm:$0xff] (!%p316_p9)   ;;  %v1036_v22 = vld [vmem:[%s1410_s4 + $0x48] sm:$0xff] (!%p316_p9)  }
  0x13   : > { %940 = vmatpush3.bf16.msra.mxu0 (!%p316_p9), %v1020_v2  ;;  %v1037_v23 = vld [vmem:[%s1410_s4 + $0x50] sm:$0xff] (!%p316_p9)   ;;  %v888_v24 = vld [vmem:[%s1408_s2] ss:$0 sm:$0xff] (!%p316_p9)  ;;  %v1038_v40 = vld [vmem:[%s1410_s4 + $0x58] sm:$0xff] (!%p316_p9)  }
  0x14   : > { %941 = vmatprep.subr.bf16.mxu0 (!%p316_p9), %v1123_v1  ;;  %628 = vmatpush1.bf16.msra.mxu1 (!%p316_p9), %v1028_v14  ;;  %v889_v26 = vld [vmem:[%s1409_s3] ss:$0 sm:$0xff] (!%p316_p9)  ;;  %v1040_v62 = vld [vmem:[%s1413_s7 + $0x8] sm:$0xff] (!%p316_p9)   ;;  %v1041_v63 = vld [vmem:[%s1413_s7 + $0x10] sm:$0xff] (!%p316_p9)  }
  0x15   : > { %s354_s18 = scalar_select %p353_p10, %s1206_s17, 1  ;;  %629 = vmatprep.subr.bf16.mxu1 %v1125_v13  ;;  %v1039_v61 = vld [vmem:[%s1413_s7] sm:$0xff]   ;;  %v1042_v0 = vld [vmem:[%s1413_s7 + $0x18] sm:$0xff]  }
  0x16   : > { %v905_v2 = vld [vmem:[%s1411_s5] ss:$0 sm:$0xff] }
  0x17   : > { %942 = vmatpush3.bf16.msra.mxu0 %v1021_v3  ;;  %s921_s27 = sshll.u32 %s354_s18, 4  ;;  %s1127_s18 = smov [#allocation2]  }
  0x18   : > { %943 = vmatprep.subr.bf16.mxu0 %v1123_v1  ;;  %s357_s12 = scalar_lea.vmem %s1406_s0, %s921_s27  ;;  %630 = vmatpush1.bf16.msra.mxu1 %v1029_v15  ;;  %s1063_s25 = sshll.u32 %s1127_s18, 4  ;;  %s1064_s25 = int_to_ptr.vmem [resolvable:$false] %s1063_s25 }
  0x19   : > { %v1271_v9 = vld [vmem:[%s357_s12] sm:$0xff]  ;;  %v1273_v10 = vld [vmem:[%s357_s12 + $0x8] sm:$0xff]  ;;  %631 = vmatprep.subr.bf16.mxu1 %v1125_v13  ;;  %s350_s12 = sand.u32 1, %s1113_s14   ;;  %s1065_s26 = scalar_lea.vmem %s1064_s25, 512 }
  0x1a   : > { %v361_v11 = vpack.c.bf16 %v1273_v10, %v1271_v9  ;;  %s877_s20 = sshll.u32 %s350_s12, 4 }
  0x1b   : > { %944 = vmatpush3.bf16.msra.mxu0 %v1022_v4  ;;  %v906_v4 = vld [vmem:[%s1412_s6] ss:$0 sm:$0xff]  ;;  %s352_s27 = scalar_lea.vmem [#allocation2], %s877_s20  ;;  %s1365_s20 = scalar_lea.sflag [#allocation3], %s350_s12 }
  0x1c   : > { %945 = vmatprep.subr.bf16.mxu0 %v1123_v1  ;;  %632 = vmatpush1.bf16.msra.mxu1 %v1030_v16  ;;  %s811_s28 = sshll.u32 %s352_s27, 4  ;;  %s1357_s28 = int_to_ptr.vmem [resolvable:$true] %s811_s28 }
  0x1d   : > { %633 = vmatprep.subr.bf16.mxu1 %v1125_v13  ;;  %s1059_s17 = scalar_lea.vmem %s1357_s28, 256  ;;  %p1066_p0 = scmp.lt.s32.totalorder %s1357_s28, %s1064_s25 }
  0x1e   : > { %p1060_p11 = scmp.ne.s32.totalorder %s1357_s28, %s1059_s17  ;;  %p1067_p1 = scmp.lt.s32.totalorder %s1065_s26, %s1059_s17 }
  0x1f   : > { %946 = vmatpush3.bf16.msra.mxu0 %v1023_v5 }
  0x20   : > { %947 = vmatprep.subr.bf16.mxu0 %v1123_v1  ;;  %634 = vmatpush1.bf16.msra.mxu1 %v1031_v17  ;;  %p1061_p12 = pnand %p1060_p11, %p1223_p5  ;;  %p1068_p2 = por %p1067_p1, %p1066_p0 }
  0x21   : > { %635 = vmatprep.subr.bf16.mxu1 %v1125_v13 }
  0x22   : > { %p1062_p13 = pneg %p1061_p12 }
  0x23   : > { %948 = vmatpush3.bf16.msra.mxu0 %v1024_v6 }
  0x24   : > { %949 = vmatprep.subr.bf16.mxu0 %v1123_v1  ;;  %636 = vmatpush1.bf16.msra.mxu1 %v1032_v18  ;;  %p1069_p3 = pnand %p1068_p2, %p1062_p13 }
  0x25   : > { %637 = vmatprep.subr.bf16.mxu1 %v1125_v13 }
  0x27   : > { %950 = vmatpush3.bf16.msra.mxu0 %v1025_v7 }
  0x28   : > { %951 = vmatprep.subr.bf16.mxu0 %v1123_v1  ;;  %638 = vmatpush1.bf16.msra.mxu1 %v1033_v19 }
  0x29   : > { %639 = vmatprep.subr.bf16.mxu1 %v1125_v13 }
  0x2b   : > { %952 = vmatpush3.bf16.msra.mxu0 %v1026_v8 }
  0x2c   : > { %957 = vmatprep.subr.bf16.mxu0 %v1123_v1  ;;  %640 = vmatpush1.bf16.msra.mxu1 %v1034_v20 }
  0x2d   : > { %641 = vmatprep.subr.bf16.mxu1 %v1125_v13 }
  0x2e   : > { %954 = vmatmul.mubr.bf16.vlgmr.msra.gmra.mrb[0].mxu0 %v361_v11 }
  0x2f   : > { %965 = vmatprep.mubr.msk.bf16.mxu0 %vm1124_vm0, %v1123_v1  ;;  %958 = vmatpush3.bf16.msra.mxu0 %v1039_v61 }
  0x30   : > { %642 = vmatpush1.bf16.msra.mxu1 %v1035_v21  ;;  %959 = vmatprep.subr.bf16.mxu0 %v1123_v1 }
  0x31   : > { %643 = vmatprep.subr.bf16.mxu1 %v1125_v13 }
  0x33   : > { %960 = vmatpush3.bf16.msra.mxu0 %v1040_v62 }
  0x34   : > { %644 = vmatpush1.bf16.msra.mxu1 %v1036_v22  ;;  %961 = vmatprep.subr.bf16.mxu0 %v1123_v1 }
  0x35   : > { %645 = vmatprep.subr.bf16.mxu1 %v1125_v13 }
  0x37   : > { %962 = vmatpush3.bf16.msra.mxu0 %v1041_v63 }
  0x38   : > { %646 = vmatpush1.bf16.msra.mxu1 %v1037_v23  ;;  %963 = vmatprep.subr.bf16.mxu0 %v1123_v1 }
  0x39   : > { %647 = vmatprep.subr.bf16.mxu1 %v1125_v13 }
  0x3b   : > { %964 = vmatpush3.bf16.msra.mxu0 %v1042_v0 }
  0x3c   : > { %648 = vmatpush1.bf16.msra.mxu1 %v1038_v40 }
 0x101   : > { %v460_v25 = vpop.f32.mrb[0].mxu0 }
 0x102   : > { %v474_v27 = vmul.f32 %v888_v24, %v460_v25  ;;  %v955_v28 = vpop.f32.mrb[1].mxu0 }
 0x103   : > { %v463_v29 = vpop.f32.mrb[2].mxu0 }
 0x104   : > { %v483_v30 = vadd.f32 %v889_v26, %v474_v27  ;;  %v475_v31 = vmul.f32 %v888_v24, %v463_v29  ;;  %v956_v32 = vpop.f32.mrb[3].mxu0  ;;  %v914_v24 = vld [vmem:[%s1414_s8] ss:$0 sm:$0xff] }
 0x106   : > { %v890_v33 = vmul.f32 -1.442695, %v483_v30  ;;  %v484_v34 = vadd.f32 %v889_v26, %v475_v31  ;;  %v915_v26 = vld [vmem:[%s1415_s9] ss:$0 sm:$0xff] }
 0x108   : > { %1043 = vpow2.f32 %v890_v33  ;;  %v891_v35 = vmul.f32 -1.442695, %v484_v34 }
 0x10a   : > { %1045 = vpow2.f32 %v891_v35 }
 0x112   : > { %v1044_v36 = vpop.eup %1043 }
 0x113   : > { %v491_v37 = vadd.f32 1.0, %v1044_v36 }
 0x114   : > { %v1046_v38 = vpop.eup %1045 }
 0x115   : > { %1047 = vrcp.f32 %v491_v37  ;;  %v492_v39 = vadd.f32 1.0, %v1046_v38 }
 0x117   : > { %1049 = vrcp.f32 %v492_v39 }
 0x11f   : > { %v1048_v41 = vpop.eup %1047 }
 0x120   : > { %v497_v42 = vmul.f32 %v1048_v41, %v483_v30 }
 0x121   : > { %v1050_v43 = vpop.eup %1049 }
 0x122   : > { %v498_v44 = vmul.f32 %v1050_v43, %v484_v34  ;;  %v502_v45 = vrot.slane %v497_v42, 7  ;;  %v509_v48 = vrot.slane %v497_v42, 1 }
 0x124   : > { %v503_v46 = vrot.slane %v498_v44, 7  ;;  %v1014_v47 = vpack.i.bf16 %v498_v44, %v497_v42  ;;  %v510_v49 = vrot.slane %v498_v44, 1  ;;  %v507_v57 = vsel %vm501_vm2, 0.0, %v502_v45 }
 0x126   : > { %1015 = vrot.lane.b32.xlu0 %v1014_v47, %s1126_s30  ;;  %v511_v50 = vsel %vm508_vm1, %v509_v48, %v510_v49  ;;  %v514_v51 = vsel %vm508_vm1, %v510_v49, 0.0  ;;  %v504_v52 = vsel %vm501_vm2, %v502_v45, %v503_v46 }
 0x127   : > { %v525_v53 = vpack.c.bf16 %v514_v51, %v511_v50 }
 0x129   : > { %904 = vmatprep.mubr.msk.bf16.mxu1 %vm521_vm3, %v525_v53 }
 0x198   : > { %v1016_v54 = vpop.permute.xlu0 %1015 }
 0x199   : > { %v1018_v55 = vunpack.i.h.bf16 %v1016_v54  ;;  %v1017_v56 = vunpack.i.l.bf16 %v1016_v54 }
 0x19b   : > { %v522_v58 = vsel %vm521_vm3, %v507_v57, %v1017_v56  ;;  %v523_v59 = vsel %vm521_vm3, %v504_v52, %v1018_v55 }
 0x19c   : > { %v524_v60 = vpack.c.bf16 %v523_v59, %v522_v58 }
 0x19e   : > { %658 = vmatmul.mubr.bf16.vlgmr.msra.gmra.mrb[0].mxu1 %v524_v60 }
 0x271   : > { %v659_v3 = vpop.f32.mrb[0].mxu1 }
 0x272   : > { %v673_v5 = vmul.f32 %v905_v2, %v659_v3  ;;  %v661_v6 = vpop.f32.mrb[1].mxu1 }
 0x273   : > { %v662_v7 = vpop.f32.mrb[2].mxu1 }
 0x274   : > { %v682_v8 = vadd.f32 %v906_v4, %v673_v5  ;;  %v674_v11 = vmul.f32 %v905_v2, %v662_v7  ;;  %v664_v1 = vpop.f32.mrb[3].mxu1 }
 0x276   : > { %v907_v12 = vmul.f32 -1.442695, %v682_v8  ;;  %v683_v13 = vadd.f32 %v906_v4, %v674_v11 }
 0x278   : > { %1051 = vpow2.f32 %v907_v12  ;;  %v908_v14 = vmul.f32 -1.442695, %v683_v13 }
 0x27a   : > { %1053 = vpow2.f32 %v908_v14 }
 0x282   : > { %v1052_v15 = vpop.eup %1051 }
 0x283   : > { %v690_v16 = vadd.f32 1.0, %v1052_v15 }
 0x284   : > { %v1054_v17 = vpop.eup %1053 }
 0x285   : > { %1055 = vrcp.f32 %v690_v16  ;;  %v691_v18 = vadd.f32 1.0, %v1054_v17 }
 0x287   : > { %1057 = vrcp.f32 %v691_v18 }
 0x28f   : > { %v1056_v19 = vpop.eup %1055 }
 0x290   : > { %v696_v21 = vmul.f32 %v1056_v19, %v682_v8 }
 0x291   : > { %v1058_v20 = vpop.eup %1057 }
 0x292   : > { %v697_v22 = vmul.f32 %v1058_v20, %v683_v13 }
 0x294   : > { %v698_v23 = vpack.c.bf16 %v697_v22, %v696_v21 }
 0x296   : > { %966 = vmatmul.mubr.msk.bf16.vlgmr.msra.gmra.mrb[4].mxu0 %vm521_vm3, %v698_v23 }
 0x369   : > { %v768_v25 = vpop.f32.mrb[4].mxu0 }
 0x36a   : > { %v782_v27 = vmul.f32 %v914_v24, %v768_v25  ;;  %v967_v28 = vpop.f32.mrb[5].mxu0 }
 0x36b   : > { %v771_v29 = vpop.f32.mrb[6].mxu0 }
 0x36c   : > { %v791_v30 = vadd.f32 %v915_v26, %v782_v27  ;;  %v783_v31 = vmul.f32 %v914_v24, %v771_v29  ;;  %v968_v32 = vpop.f32.mrb[7].mxu0 }
 0x36e   : > { %v793_v33 = vadd.f32 %v791_v30, %v1271_v9  ;;  %v792_v34 = vadd.f32 %v915_v26, %v783_v31 }
 0x370   : > { %795 = vst [vmem:[%s352_s27] sm:$0xff] %v793_v33  ;;  %v794_v35 = vadd.f32 %v792_v34, %v1273_v10 }
 0x372   : > { %796 = vst [vmem:[%s352_s27 + $0x8] sm:$0xff] %v794_v35 }
 0x373   : > { %1072 = shalt.err (!%p1069_p3)
}
 0x374   : > { %s1073_s12 = scalar_lea.hbm %s1362_s21, 256  ;;  %s1077_s30 = scalar_lea.hbm %s1416_s10, 512 }
 0x375   : > { %p1074_p4 = scmp.ne.s32.totalorder %s1362_s21, %s1073_s12  ;;  %p1078_p9 = scmp.lt.u32.totalorder %s1362_s21, %s1416_s10 }
 0x376   : > { %p1079_p10 = scmp.lt.u32.totalorder %s1077_s30, %s1073_s12  ;;  %p1081_p12 = scmp.lt.u32.totalorder %s1073_s12, %s1362_s21 }
 0x377   : > { %p1075_p7 = pnand %p1074_p4, %p1223_p5 }
 0x378   : > { %p1080_p11 = por %p1079_p10, %p1078_p9 }
 0x379   : > { %p1076_p8 = pneg %p1075_p7 }
 0x37a   : > { %p1082_p13 = por %p1081_p12, %p1080_p11 }
 0x37c   : > { %p1083_p0 = pnand %p1082_p13, %p1076_p8 }
 0x37e   : > { %1086 = shalt.err (!%p1083_p0)
}
 0x37f   : > { %s1128_s17 = smov 128   ;;  %s1129_s25 = smov 8  }
 0x380   : > { %969 = dma.vmem_to_hbm [thread:$0]  (%p1223_p5), %s1357_s28, 256, %s1362_s21, %s1365_s20, %s1128_s17, %s1128_s17, %s1129_s25  }
 0x381 PF: > { %p975_p1 = scmp.ge.s32.totalorder %s1121_s16, 2  ;;  %s826_s26 = sand.u32 1, %s1109_s13  }
 0x382   : > { %s827_s12 = scalar_lea.sflag [#allocation3], %s826_s26 }
 0x383   : > { %p972_p2 = pnand %p975_p1, %p1227_p6 }
 0x385   : > { %1104 = dma.done.wait (!%p972_p2), %s827_s12, 256  }
 0x386   : > { %1106 = vsyncadd (!%p972_p2), %s827_s12, 4294967040  ;;  %p20_p3 = scmp.ge.s32.totalorder %s1210_s19, 4   ;;  %s1419_s13 = smov %s1113_s14 }
 0x387   : > { %s1420_s14 = smov %s1117_s15  ;;  %s1421_s15 = smov %s1221_s22 }
 0x388   : > { %s1422_s16 = smov %s1210_s19  ;;  %22 = sbr.rel (!%p20_p3) target bundleno = 3 (0x3), region = 95 }
 0x38f   :  { %832 = vsyncpa [#allocation3], 1 }
 0x390   :  { %834 = vsyncpa [#allocation3 + $0x1], 1 }

</bundles_post_ra>
